<compile_context>
chip_gen: v5e
topology: v5e:2x2
jax: 0.10.0
libtpu: 0.0.40
codegen_flags: <defaults>
</compile_context>

<pallas_src>
import jax
import jax.numpy as jnp
from jax.experimental import pallas as pl
from jax.experimental.pallas import tpu as pltpu

_MIB = 1024 * 1024


def _vmem_limit_bytes():
    """Scoped-VMEM limit derived from the physical capacity of this chip."""
    try:
        cap = int(pltpu.get_tpu_info().vmem_capacity_bytes)
    except Exception:          # info unavailable -> be conservative (v7x-sized)
        cap = 64 * _MIB
    # v7x (64 MiB/TC) -> ~48 MiB limit; v5e/v6e (128 MiB) -> 96 MiB limit.
    return int(min(cap * 3 // 4, 96 * _MIB))


def _choose_tb(B, C, itemsize, vmem_limit, block_rows=None):
    """Pick a batch-tile size (multiple of the sublane packing for the dtype).

    Budget = 3 pred tensors x 2 pipeline buffers in native dtype, plus ~4
    f32-tile-equivalents of in-kernel temporaries (f32 upcast, exp(p-m), the
    int32 `col` iota and one select output), kept under ~80% of the scoped
    VMEM limit so the pipeline stays double-buffered without spilling.
    """
    sub = max(8, 32 // max(1, itemsize))          # 8 for f32, 16 for bf16
    b_pad = ((B + sub - 1) // sub) * sub
    if block_rows is not None:
        tb = max(sub, (int(block_rows) // sub) * sub)
        return min(tb, b_pad)
    per_row = 3 * 2 * C * itemsize + 4 * C * 4
    budget = int(vmem_limit * 0.8)
    tb = budget // max(1, per_row)
    tb = min(tb, 1024, b_pad)
    tb = max(sub, (tb // sub) * sub)
    return int(tb)


def _make_kernel(B, C, TB, needs_mask):
    def kernel(p1_ref, p2_ref, p3_ref, tgt_ref, pos_ref, out_ref,
               a_ce1, a_ce2p, a_pos, a_c1, a_c2, a_c3):
        i = pl.program_id(1)                 # block index within this split
        nb = pl.num_programs(1)

        # --- init per-split vector accumulators on the first inner step -----
        @pl.when(i == 0)
        def _():
            a_ce1[...] = jnp.zeros_like(a_ce1)
            a_ce2p[...] = jnp.zeros_like(a_ce2p)
            a_pos[...] = jnp.zeros_like(a_pos)
            a_c1[...] = jnp.zeros_like(a_c1)
            a_c2[...] = jnp.zeros_like(a_c2)
            a_c3[...] = jnp.zeros_like(a_c3)

        tgt = tgt_ref[...]                          # (TB, 1) int32
        pos = pos_ref[...].astype(jnp.float32)      # (TB, 1) float32 {0,1}

        col = jax.lax.broadcasted_iota(jnp.int32, (TB, C), 1)   # (TB, C)

        if needs_mask:
            # Logical (unclamped) global block index -> row validity mask.
            blk = pl.program_id(0) * nb + i
            row = blk * TB + jax.lax.broadcasted_iota(jnp.int32, (TB, 1), 0)
            valid = row < B                          # (TB, 1) bool
            pos = jnp.where(valid, pos, 0.0)
        else:
            valid = None

        def mask(x):
            # NOTE: select masking (NOT multiplication) — padded / duplicated
            # rows may carry NaN/Inf CE values and NaN * 0.0 would poison sums.
            return x if valid is None else jnp.where(valid, x, 0.0)

        onehot = col == tgt          # (TB, C) — shared by pred_1 and pred_2

        def ce_and_correct(p_raw):
            p = p_raw.astype(jnp.float32)            # native DMA, in-kernel cast
            m = jnp.max(p, axis=-1, keepdims=True)                      # (TB,1)
            lse = m + jnp.log(jnp.sum(jnp.exp(p - m), axis=-1,
                                      keepdims=True))                   # (TB,1)
            tgt_logit = jnp.sum(jnp.where(onehot, p, 0.0),
                                axis=-1, keepdims=True)                  # (TB,1)
            ce = lse - tgt_logit
            # argmax with first-max tie-breaking (matches jnp.argmax).
            argmax = jnp.min(jnp.where(p == m, col, C), axis=-1,
                             keepdims=True)
            correct = (argmax == tgt).astype(jnp.float32)
            return ce, correct

        def correct_only(p_raw):
            # Argmax-only path for pred_3: no exp/log/lse (saves EUP work).
            p = p_raw.astype(jnp.float32)
            m = jnp.max(p, axis=-1, keepdims=True)
            argmax = jnp.min(jnp.where(p == m, col, C), axis=-1,
                             keepdims=True)
            return (argmax == tgt).astype(jnp.float32)

        ce1, c1 = ce_and_correct(p1_ref[...])
        ce2, c2 = ce_and_correct(p2_ref[...])
        c3 = correct_only(p3_ref[...])

        # Deferred scalar collapse: cheap per-row VPU adds into persistent
        # VMEM accumulators (no per-step sublane reduce / SMEM scalar sync).
        a_ce1[...] += mask(ce1)
        # pos is already row-masked; select (not multiply) keeps NaN out.
        a_ce2p[...] += jnp.where(pos > 0.0, ce2, 0.0)
        a_pos[...] += pos
        a_c1[...] += mask(c1)
        a_c2[...] += mask(c2)
        a_c3[...] += mask(c3)

        # --- finalize: collapse to scalars once per split --------------------
        @pl.when(i == nb - 1)
        def _():
            # Only row 0 of the (8, 8) SMEM output block is meaningful.
            out_ref[0, 0] = jnp.sum(a_ce1[...])      # sum CE(pred_1)
            out_ref[0, 1] = jnp.sum(a_ce2p[...])     # sum CE(pred_2) * pos
            out_ref[0, 2] = jnp.sum(a_pos[...])      # n_positive (partial)
            out_ref[0, 3] = jnp.sum(a_c1[...])       # correct count pred_1
            out_ref[0, 4] = jnp.sum(a_c2[...])       # correct count pred_2
            out_ref[0, 5] = jnp.sum(a_c3[...])       # correct count pred_3
            out_ref[0, 6] = jnp.float32(0.0)
            out_ref[0, 7] = jnp.float32(0.0)

    return kernel


def class_specific_ce(pred_1, pred_2, pred_3, ind_positive_sample, targets,
                      lambda_weight=1.0, block_rows=None, num_splits=2):
    """Pallas implementation of ClassSpecificCE.forward.

    num_splits=2 shards the batch grid across both TensorCores on v7x (the
    first grid axis is "parallel"); on single-TC chips it is effectively a
    no-op and the two partial rows are just summed in the wrapper.
    """
    B, C = pred_1.shape
    tgt = targets.astype(jnp.int32).reshape(B, 1)
    pos = ind_positive_sample.astype(jnp.float32).reshape(B, 1)

    itemsize = jnp.dtype(pred_1.dtype).itemsize
    vmem_limit = _vmem_limit_bytes()
    TB = _choose_tb(B, C, itemsize, vmem_limit, block_rows)

    num_blocks = pl.cdiv(B, TB)
    S = max(1, min(int(num_splits), num_blocks))
    nb = pl.cdiv(num_blocks, S)
    # Any padded or clamped-duplicate rows anywhere in the (S, nb) grid?
    needs_mask = (S * nb * TB) != B

    kernel = _make_kernel(B, C, TB, needs_mask)

    def blk_map(s, i):
        # Clamp so fully out-of-range blocks re-read a valid tile; their
        # contribution is zeroed by the in-kernel logical row mask.
        return (jnp.minimum(s * nb + i, num_blocks - 1), 0)

    pred_spec = pl.BlockSpec((TB, C), blk_map)
    vec_spec = pl.BlockSpec((TB, 1), blk_map)
    # One (8, 8) SMEM block per split; only row 0 carries the partial sums
    # (rows 1..7 just pad the block to the sublane multiple and are unread).
    out_spec = pl.BlockSpec((8, 8), lambda s, i: (s, 0),
                            memory_space=pltpu.MemorySpace.SMEM)

    grid_spec = pltpu.PrefetchScalarGridSpec(
        num_scalar_prefetch=0,
        grid=(S, nb),
        in_specs=[pred_spec, pred_spec, pred_spec, vec_spec, vec_spec],
        out_specs=out_spec,
        scratch_shapes=[pltpu.VMEM((TB, 1), jnp.float32)] * 6,
    )

    out = pl.pallas_call(
        kernel,
        out_shape=jax.ShapeDtypeStruct((8 * S, 8), jnp.float32),
        grid_spec=grid_spec,
        compiler_params=pltpu.CompilerParams(
            dimension_semantics=("parallel", "arbitrary"),
            vmem_limit_bytes=vmem_limit,
        ),
    )(pred_1, pred_2, pred_3, tgt, pos)   # preds in native dtype (no f32 cast)

    # Combine per-split partial sums; the n_pos division happens after combine.
    partial = out.reshape(S, 8, 8)[:, 0, :]           # (S, 8)
    tot = jnp.sum(partial, axis=0)                    # (8,)
    inv_b = 1.0 / float(B)
    loss_disc = tot[0] * inv_b
    n_pos = tot[2]
    loss_interp = jnp.where(n_pos > 0.0,
                            tot[1] / jnp.maximum(n_pos, 1.0), 0.0)
    loss_total = loss_disc + loss_interp * float(lambda_weight)

    return {
        "loss_discrimination": loss_disc,
        "loss_interpretation": loss_interp,
        "loss_total": loss_total,
        # n_pos is accumulated in f32 -> exact up to 2^24 samples.
        "n_positive_sample": n_pos.astype(jnp.int32),
        "ACC1": tot[3] * inv_b,
        "ACC2": tot[4] * inv_b,
        "ACC3": tot[5] * inv_b,
    }


def _reference(pred_1, pred_2, pred_3, ind_positive_sample, targets,
               lambda_weight=1.0):
    """Plain-JAX reference mirroring the PyTorch module."""
    def ce(logits, tgt, mask=None):
        logp = jax.nn.log_softmax(logits.astype(jnp.float32), axis=-1)
        nll = -jnp.take_along_axis(logp, tgt[:, None], axis=-1)[:, 0]
        if mask is None:
            return jnp.mean(nll)
        m = mask.astype(jnp.float32)
        n = jnp.sum(m)
        return jnp.where(n > 0, jnp.sum(nll * m) / jnp.maximum(n, 1.0), 0.0)

    n_pos = jnp.sum(ind_positive_sample.astype(jnp.int32))
    acc = lambda p: jnp.mean(
        (jnp.argmax(p.astype(jnp.float32), -1) == targets).astype(jnp.float32))
    loss_disc = ce(pred_1, targets)
    loss_interp = ce(pred_2, targets, ind_positive_sample)
    return {
        "loss_discrimination": loss_disc,
        "loss_interpretation": loss_interp,
        "loss_total": loss_disc + loss_interp * lambda_weight,
        "n_positive_sample": n_pos,
        "ACC1": acc(pred_1), "ACC2": acc(pred_2), "ACC3": acc(pred_3),
    }


def _check(out, ref, tol=1e-4):
    for k in ("loss_discrimination", "loss_interpretation", "loss_total",
              "ACC1", "ACC2", "ACC3"):
        assert abs(float(out[k]) - float(ref[k])) < tol, (k, out[k], ref[k])
    assert int(out["n_positive_sample"]) == int(ref["n_positive_sample"])


if __name__ == "__main__":
    key = jax.random.PRNGKey(0)

    # --- test 1: tiny f32 case, single block, single split -------------------
    B, C = 8, 32
    k1, k2, k3, k4, k5 = jax.random.split(key, 5)
    p1 = jax.random.normal(k1, (B, C), jnp.float32)
    p2 = jax.random.normal(k2, (B, C), jnp.float32)
    p3 = jax.random.normal(k3, (B, C), jnp.float32)
    tgt = jax.random.randint(k4, (B,), 0, C, jnp.int32)
    pos = jax.random.bernoulli(k5, 0.5, (B,))

    out = class_specific_ce(p1, p2, p3, pos, tgt, lambda_weight=1.0)
    out = jax.tree_util.tree_map(jax.block_until_ready, out)
    _check(out, _reference(p1, p2, p3, pos, tgt, 1.0))

    # --- test 2: 2-way split, multi-block grid, partial + clamped tiles ------
    B2 = 20
    k1, k2, k3, k4, k5 = jax.random.split(jax.random.PRNGKey(1), 5)
    q1 = jax.random.normal(k1, (B2, C), jnp.float32)
    q2 = jax.random.normal(k2, (B2, C), jnp.float32)
    q3 = jax.random.normal(k3, (B2, C), jnp.float32)
    tgt2 = jax.random.randint(k4, (B2,), 0, C, jnp.int32)
    pos2 = jax.random.bernoulli(k5, 0.5, (B2,))

    out2 = class_specific_ce(q1, q2, q3, pos2, tgt2, lambda_weight=0.5,
                             block_rows=8, num_splits=2)   # grid=(2,2)
    out2 = jax.tree_util.tree_map(jax.block_until_ready, out2)
    _check(out2, _reference(q1, q2, q3, pos2, tgt2, 0.5))

    # --- test 3: bf16 inputs DMA'd natively, upcast inside the kernel --------
    p1b, p2b, p3b = (p.astype(jnp.bfloat16) for p in (p1, p2, p3))
    out3 = class_specific_ce(p1b, p2b, p3b, pos, tgt, lambda_weight=1.0)
    out3 = jax.tree_util.tree_map(jax.block_until_ready, out3)
    _check(out3, _reference(p1b, p2b, p3b, pos, tgt, 1.0), tol=1e-3)

    print("KERNEL_OK")
</pallas_src>

<mosaic_0001>
module attributes {stable_mosaic.version = 11 : i64} {
  func.func @kernel(%arg0: i32, %arg1: i32, %arg2: memref<8x32xf32, #tpu.memory_space<vmem>>, %arg3: memref<8x32xf32, #tpu.memory_space<vmem>>, %arg4: memref<8x32xf32, #tpu.memory_space<vmem>>, %arg5: memref<8x1xi32, #tpu.memory_space<vmem>>, %arg6: memref<8x1xf32, #tpu.memory_space<vmem>>, %arg7: memref<8x8xf32, #tpu.memory_space<smem>>, %arg8: memref<8x1xf32, #tpu.memory_space<vmem>>, %arg9: memref<8x1xf32, #tpu.memory_space<vmem>>, %arg10: memref<8x1xf32, #tpu.memory_space<vmem>>, %arg11: memref<8x1xf32, #tpu.memory_space<vmem>>, %arg12: memref<8x1xf32, #tpu.memory_space<vmem>>, %arg13: memref<8x1xf32, #tpu.memory_space<vmem>>) attributes {dimension_semantics = [#tpu.dimension_semantics<parallel>, #tpu.dimension_semantics<arbitrary>], iteration_bounds = array<i64: 1, 1>, scalar_prefetch = 0 : i64, scratch_operands = 6 : i64, tpu.core_type = #tpu.core_type<tc>, window_params = [{transform_indices = @transform_0, window_bounds = array<i64: 8, 32>}, {transform_indices = @transform_1, window_bounds = array<i64: 8, 32>}, {transform_indices = @transform_2, window_bounds = array<i64: 8, 32>}, {transform_indices = @transform_3, window_bounds = array<i64: 8, 1>}, {transform_indices = @transform_4, window_bounds = array<i64: 8, 1>}, {transform_indices = @transform_5, window_bounds = array<i64: 8, 8>}]} {
    %c0_i32 = arith.constant 0 : i32
    %0 = arith.cmpi eq, %arg1, %c0_i32 : i32
    %1 = arith.extui %0 : i1 to i32
    %c0_i32_0 = arith.constant 0 : i32
    %2 = arith.cmpi ne, %1, %c0_i32_0 : i32
    scf.if %2 {
      %cst_51 = arith.constant 0.000000e+00 : f32
      %93 = vector.broadcast %cst_51 : f32 to vector<8x1xf32>
      %c0_52 = arith.constant 0 : index
      %c0_53 = arith.constant 0 : index
      %94 = vector.load %arg8[%c0_52, %c0_53] : memref<8x1xf32, #tpu.memory_space<vmem>>, vector<8x1xf32>
      tpu.vector_store %arg8[%c0_52, %c0_53], %93 {strides = array<i32>} : memref<8x1xf32, #tpu.memory_space<vmem>>, vector<8x1xf32>,
      %cst_54 = arith.constant 0.000000e+00 : f32
      %95 = vector.broadcast %cst_54 : f32 to vector<8x1xf32>
      %c0_55 = arith.constant 0 : index
      %c0_56 = arith.constant 0 : index
      %96 = vector.load %arg9[%c0_55, %c0_56] : memref<8x1xf32, #tpu.memory_space<vmem>>, vector<8x1xf32>
      tpu.vector_store %arg9[%c0_55, %c0_56], %95 {strides = array<i32>} : memref<8x1xf32, #tpu.memory_space<vmem>>, vector<8x1xf32>,
      %cst_57 = arith.constant 0.000000e+00 : f32
      %97 = vector.broadcast %cst_57 : f32 to vector<8x1xf32>
      %c0_58 = arith.constant 0 : index
      %c0_59 = arith.constant 0 : index
      %98 = vector.load %arg10[%c0_58, %c0_59] : memref<8x1xf32, #tpu.memory_space<vmem>>, vector<8x1xf32>
      tpu.vector_store %arg10[%c0_58, %c0_59], %97 {strides = array<i32>} : memref<8x1xf32, #tpu.memory_space<vmem>>, vector<8x1xf32>,
      %cst_60 = arith.constant 0.000000e+00 : f32
      %99 = vector.broadcast %cst_60 : f32 to vector<8x1xf32>
      %c0_61 = arith.constant 0 : index
      %c0_62 = arith.constant 0 : index
      %100 = vector.load %arg11[%c0_61, %c0_62] : memref<8x1xf32, #tpu.memory_space<vmem>>, vector<8x1xf32>
      tpu.vector_store %arg11[%c0_61, %c0_62], %99 {strides = array<i32>} : memref<8x1xf32, #tpu.memory_space<vmem>>, vector<8x1xf32>,
      %cst_63 = arith.constant 0.000000e+00 : f32
      %101 = vector.broadcast %cst_63 : f32 to vector<8x1xf32>
      %c0_64 = arith.constant 0 : index
      %c0_65 = arith.constant 0 : index
      %102 = vector.load %arg12[%c0_64, %c0_65] : memref<8x1xf32, #tpu.memory_space<vmem>>, vector<8x1xf32>
      tpu.vector_store %arg12[%c0_64, %c0_65], %101 {strides = array<i32>} : memref<8x1xf32, #tpu.memory_space<vmem>>, vector<8x1xf32>,
      %cst_66 = arith.constant 0.000000e+00 : f32
      %103 = vector.broadcast %cst_66 : f32 to vector<8x1xf32>
      %c0_67 = arith.constant 0 : index
      %c0_68 = arith.constant 0 : index
      %104 = vector.load %arg13[%c0_67, %c0_68] : memref<8x1xf32, #tpu.memory_space<vmem>>, vector<8x1xf32>
      tpu.vector_store %arg13[%c0_67, %c0_68], %103 {strides = array<i32>} : memref<8x1xf32, #tpu.memory_space<vmem>>, vector<8x1xf32>,
    } else {
    }
    %c0 = arith.constant 0 : index
    %c0_1 = arith.constant 0 : index
    %3 = vector.load %arg5[%c0, %c0_1] : memref<8x1xi32, #tpu.memory_space<vmem>>, vector<8x1xi32>
    %c0_2 = arith.constant 0 : index
    %c0_3 = arith.constant 0 : index
    %4 = vector.load %arg6[%c0_2, %c0_3] : memref<8x1xf32, #tpu.memory_space<vmem>>, vector<8x1xf32>
    %5 = tpu.iota {dimensions = array<i32: 1>} : vector<8x32xi32>
    %6 = vector.broadcast %3 : vector<8x1xi32> to vector<8x32xi32>
    %7 = arith.cmpi eq, %5, %6 : vector<8x32xi32>
    %c0_4 = arith.constant 0 : index
    %c0_5 = arith.constant 0 : index
    %8 = vector.load %arg2[%c0_4, %c0_5] : memref<8x32xf32, #tpu.memory_space<vmem>>, vector<8x32xf32>
    %cst = arith.constant dense<0xFF800000> : vector<8xf32>
    %9 = vector.multi_reduction <maximumf>, %8, %cst [1] : vector<8x32xf32> to vector<8xf32>
    %10 = vector.shape_cast %9 : vector<8xf32> to vector<8x1xf32>
    %11 = vector.broadcast %10 : vector<8x1xf32> to vector<8x32xf32>
    %12 = arith.subf %8, %11 : vector<8x32xf32>
    %13 = math.exp %12 : vector<8x32xf32>
    %cst_6 = arith.constant dense<0.000000e+00> : vector<8xf32>
    %14 = vector.multi_reduction <add>, %13, %cst_6 [1] : vector<8x32xf32> to vector<8xf32>
    %15 = vector.shape_cast %14 : vector<8xf32> to vector<8x1xf32>
    %16 = math.log %15 : vector<8x1xf32>
    %17 = arith.addf %10, %16 : vector<8x1xf32>
    %cst_7 = arith.constant 0.000000e+00 : f32
    %18 = vector.broadcast %cst_7 : f32 to vector<8x32xf32>
    %19 = arith.select %7, %8, %18 : vector<8x32xi1>, vector<8x32xf32>
    %cst_8 = arith.constant dense<0.000000e+00> : vector<8xf32>
    %20 = vector.multi_reduction <add>, %19, %cst_8 [1] : vector<8x32xf32> to vector<8xf32>
    %21 = vector.shape_cast %20 : vector<8xf32> to vector<8x1xf32>
    %22 = arith.subf %17, %21 : vector<8x1xf32>
    %23 = vector.broadcast %10 : vector<8x1xf32> to vector<8x32xf32>
    %24 = arith.cmpf oeq, %8, %23 : vector<8x32xf32>
    %c32_i32 = arith.constant 32 : i32
    %25 = vector.broadcast %c32_i32 : i32 to vector<8x32xi32>
    %26 = arith.select %24, %5, %25 : vector<8x32xi1>, vector<8x32xi32>
    %cst_9 = arith.constant dense<2147483647> : vector<8xi32>
    %27 = vector.multi_reduction <minsi>, %26, %cst_9 [1] : vector<8x32xi32> to vector<8xi32>
    %28 = vector.shape_cast %27 : vector<8xi32> to vector<8x1xi32>
    %29 = arith.cmpi eq, %28, %3 : vector<8x1xi32>
    %30 = arith.extui %29 : vector<8x1xi1> to vector<8x1xi32>
    %31 = arith.sitofp %30 : vector<8x1xi32> to vector<8x1xf32>
    %c0_10 = arith.constant 0 : index
    %c0_11 = arith.constant 0 : index
    %32 = vector.load %arg3[%c0_10, %c0_11] : memref<8x32xf32, #tpu.memory_space<vmem>>, vector<8x32xf32>
    %cst_12 = arith.constant dense<0xFF800000> : vector<8xf32>
    %33 = vector.multi_reduction <maximumf>, %32, %cst_12 [1] : vector<8x32xf32> to vector<8xf32>
    %34 = vector.shape_cast %33 : vector<8xf32> to vector<8x1xf32>
    %35 = vector.broadcast %34 : vector<8x1xf32> to vector<8x32xf32>
    %36 = arith.subf %32, %35 : vector<8x32xf32>
    %37 = math.exp %36 : vector<8x32xf32>
    %cst_13 = arith.constant dense<0.000000e+00> : vector<8xf32>
    %38 = vector.multi_reduction <add>, %37, %cst_13 [1] : vector<8x32xf32> to vector<8xf32>
    %39 = vector.shape_cast %38 : vector<8xf32> to vector<8x1xf32>
    %40 = math.log %39 : vector<8x1xf32>
    %41 = arith.addf %34, %40 : vector<8x1xf32>
    %cst_14 = arith.constant 0.000000e+00 : f32
    %42 = vector.broadcast %cst_14 : f32 to vector<8x32xf32>
    %43 = arith.select %7, %32, %42 : vector<8x32xi1>, vector<8x32xf32>
    %cst_15 = arith.constant dense<0.000000e+00> : vector<8xf32>
    %44 = vector.multi_reduction <add>, %43, %cst_15 [1] : vector<8x32xf32> to vector<8xf32>
    %45 = vector.shape_cast %44 : vector<8xf32> to vector<8x1xf32>
    %46 = arith.subf %41, %45 : vector<8x1xf32>
    %47 = vector.broadcast %34 : vector<8x1xf32> to vector<8x32xf32>
    %48 = arith.cmpf oeq, %32, %47 : vector<8x32xf32>
    %c32_i32_16 = arith.constant 32 : i32
    %49 = vector.broadcast %c32_i32_16 : i32 to vector<8x32xi32>
    %50 = arith.select %48, %5, %49 : vector<8x32xi1>, vector<8x32xi32>
    %cst_17 = arith.constant dense<2147483647> : vector<8xi32>
    %51 = vector.multi_reduction <minsi>, %50, %cst_17 [1] : vector<8x32xi32> to vector<8xi32>
    %52 = vector.shape_cast %51 : vector<8xi32> to vector<8x1xi32>
    %53 = arith.cmpi eq, %52, %3 : vector<8x1xi32>
    %54 = arith.extui %53 : vector<8x1xi1> to vector<8x1xi32>
    %55 = arith.sitofp %54 : vector<8x1xi32> to vector<8x1xf32>
    %c0_18 = arith.constant 0 : index
    %c0_19 = arith.constant 0 : index
    %56 = vector.load %arg4[%c0_18, %c0_19] : memref<8x32xf32, #tpu.memory_space<vmem>>, vector<8x32xf32>
    %cst_20 = arith.constant dense<0xFF800000> : vector<8xf32>
    %57 = vector.multi_reduction <maximumf>, %56, %cst_20 [1] : vector<8x32xf32> to vector<8xf32>
    %58 = vector.shape_cast %57 : vector<8xf32> to vector<8x1xf32>
    %59 = vector.broadcast %58 : vector<8x1xf32> to vector<8x32xf32>
    %60 = arith.cmpf oeq, %56, %59 : vector<8x32xf32>
    %c32_i32_21 = arith.constant 32 : i32
    %61 = vector.broadcast %c32_i32_21 : i32 to vector<8x32xi32>
    %62 = arith.select %60, %5, %61 : vector<8x32xi1>, vector<8x32xi32>
    %cst_22 = arith.constant dense<2147483647> : vector<8xi32>
    %63 = vector.multi_reduction <minsi>, %62, %cst_22 [1] : vector<8x32xi32> to vector<8xi32>
    %64 = vector.shape_cast %63 : vector<8xi32> to vector<8x1xi32>
    %65 = arith.cmpi eq, %64, %3 : vector<8x1xi32>
    %66 = arith.extui %65 : vector<8x1xi1> to vector<8x1xi32>
    %67 = arith.sitofp %66 : vector<8x1xi32> to vector<8x1xf32>
    %c0_23 = arith.constant 0 : index
    %c0_24 = arith.constant 0 : index
    %68 = vector.load %arg8[%c0_23, %c0_24] : memref<8x1xf32, #tpu.memory_space<vmem>>, vector<8x1xf32>
    %69 = arith.addf %68, %22 : vector<8x1xf32>
    %c0_25 = arith.constant 0 : index
    %c0_26 = arith.constant 0 : index
    %70 = vector.load %arg8[%c0_25, %c0_26] : memref<8x1xf32, #tpu.memory_space<vmem>>, vector<8x1xf32>
    tpu.vector_store %arg8[%c0_25, %c0_26], %69 {strides = array<i32>} : memref<8x1xf32, #tpu.memory_space<vmem>>, vector<8x1xf32>,
    %c0_27 = arith.constant 0 : index
    %c0_28 = arith.constant 0 : index
    %71 = vector.load %arg9[%c0_27, %c0_28] : memref<8x1xf32, #tpu.memory_space<vmem>>, vector<8x1xf32>
    %cst_29 = arith.constant 0.000000e+00 : f32
    %72 = vector.broadcast %cst_29 : f32 to vector<8x1xf32>
    %73 = arith.cmpf ogt, %4, %72 : vector<8x1xf32>
    %cst_30 = arith.constant 0.000000e+00 : f32
    %74 = vector.broadcast %cst_30 : f32 to vector<8x1xf32>
    %75 = arith.select %73, %46, %74 : vector<8x1xi1>, vector<8x1xf32>
    %76 = arith.addf %71, %75 : vector<8x1xf32>
    %c0_31 = arith.constant 0 : index
    %c0_32 = arith.constant 0 : index
    %77 = vector.load %arg9[%c0_31, %c0_32] : memref<8x1xf32, #tpu.memory_space<vmem>>, vector<8x1xf32>
    tpu.vector_store %arg9[%c0_31, %c0_32], %76 {strides = array<i32>} : memref<8x1xf32, #tpu.memory_space<vmem>>, vector<8x1xf32>,
    %c0_33 = arith.constant 0 : index
    %c0_34 = arith.constant 0 : index
    %78 = vector.load %arg10[%c0_33, %c0_34] : memref<8x1xf32, #tpu.memory_space<vmem>>, vector<8x1xf32>
    %79 = arith.addf %78, %4 : vector<8x1xf32>
    %c0_35 = arith.constant 0 : index
    %c0_36 = arith.constant 0 : index
    %80 = vector.load %arg10[%c0_35, %c0_36] : memref<8x1xf32, #tpu.memory_space<vmem>>, vector<8x1xf32>
    tpu.vector_store %arg10[%c0_35, %c0_36], %79 {strides = array<i32>} : memref<8x1xf32, #tpu.memory_space<vmem>>, vector<8x1xf32>,
    %c0_37 = arith.constant 0 : index
    %c0_38 = arith.constant 0 : index
    %81 = vector.load %arg11[%c0_37, %c0_38] : memref<8x1xf32, #tpu.memory_space<vmem>>, vector<8x1xf32>
    %82 = arith.addf %81, %31 : vector<8x1xf32>
    %c0_39 = arith.constant 0 : index
    %c0_40 = arith.constant 0 : index
    %83 = vector.load %arg11[%c0_39, %c0_40] : memref<8x1xf32, #tpu.memory_space<vmem>>, vector<8x1xf32>
    tpu.vector_store %arg11[%c0_39, %c0_40], %82 {strides = array<i32>} : memref<8x1xf32, #tpu.memory_space<vmem>>, vector<8x1xf32>,
    %c0_41 = arith.constant 0 : index
    %c0_42 = arith.constant 0 : index
    %84 = vector.load %arg12[%c0_41, %c0_42] : memref<8x1xf32, #tpu.memory_space<vmem>>, vector<8x1xf32>
    %85 = arith.addf %84, %55 : vector<8x1xf32>
    %c0_43 = arith.constant 0 : index
    %c0_44 = arith.constant 0 : index
    %86 = vector.load %arg12[%c0_43, %c0_44] : memref<8x1xf32, #tpu.memory_space<vmem>>, vector<8x1xf32>
    tpu.vector_store %arg12[%c0_43, %c0_44], %85 {strides = array<i32>} : memref<8x1xf32, #tpu.memory_space<vmem>>, vector<8x1xf32>,
    %c0_45 = arith.constant 0 : index
    %c0_46 = arith.constant 0 : index
    %87 = vector.load %arg13[%c0_45, %c0_46] : memref<8x1xf32, #tpu.memory_space<vmem>>, vector<8x1xf32>
    %88 = arith.addf %87, %67 : vector<8x1xf32>
    %c0_47 = arith.constant 0 : index
    %c0_48 = arith.constant 0 : index
    %89 = vector.load %arg13[%c0_47, %c0_48] : memref<8x1xf32, #tpu.memory_space<vmem>>, vector<8x1xf32>
    tpu.vector_store %arg13[%c0_47, %c0_48], %88 {strides = array<i32>} : memref<8x1xf32, #tpu.memory_space<vmem>>, vector<8x1xf32>,
    %c0_i32_49 = arith.constant 0 : i32
    %90 = arith.cmpi eq, %arg1, %c0_i32_49 : i32
    %91 = arith.extui %90 : i1 to i32
    %c0_i32_50 = arith.constant 0 : i32
    %92 = arith.cmpi ne, %91, %c0_i32_50 : i32
    scf.if %92 {
      %c0_51 = arith.constant 0 : index
      %c0_52 = arith.constant 0 : index
      %93 = vector.load %arg8[%c0_51, %c0_52] : memref<8x1xf32, #tpu.memory_space<vmem>>, vector<8x1xf32>
      %94 = vector.shape_cast %93 : vector<8x1xf32> to vector<1x8x1xf32>
      %cst_53 = arith.constant dense<0.000000e+00> : vector<1xf32>
      %95 = vector.multi_reduction <add>, %94, %cst_53 [1, 2] : vector<1x8x1xf32> to vector<1xf32>
      %96 = vector.shape_cast %95 : vector<1xf32> to vector<1x1x1xf32>
      %97 = vector.extract %96[0, 0, 0] : f32 from vector<1x1x1xf32>
      %c0_54 = arith.constant 0 : index
      %c0_55 = arith.constant 0 : index
      %98 = memref.load %arg7[%c0_54, %c0_55] : memref<8x8xf32, #tpu.memory_space<smem>>
      memref.store %97, %arg7[%c0_54, %c0_55] : memref<8x8xf32, #tpu.memory_space<smem>>
      %c0_56 = arith.constant 0 : index
      %c0_57 = arith.constant 0 : index
      %99 = vector.load %arg9[%c0_56, %c0_57] : memref<8x1xf32, #tpu.memory_space<vmem>>, vector<8x1xf32>
      %100 = vector.shape_cast %99 : vector<8x1xf32> to vector<1x8x1xf32>
      %cst_58 = arith.constant dense<0.000000e+00> : vector<1xf32>
      %101 = vector.multi_reduction <add>, %100, %cst_58 [1, 2] : vector<1x8x1xf32> to vector<1xf32>
      %102 = vector.shape_cast %101 : vector<1xf32> to vector<1x1x1xf32>
      %103 = vector.extract %102[0, 0, 0] : f32 from vector<1x1x1xf32>
      %c0_59 = arith.constant 0 : index
      %c1 = arith.constant 1 : index
      %104 = memref.load %arg7[%c0_59, %c1] : memref<8x8xf32, #tpu.memory_space<smem>>
      memref.store %103, %arg7[%c0_59, %c1] : memref<8x8xf32, #tpu.memory_space<smem>>
      %c0_60 = arith.constant 0 : index
      %c0_61 = arith.constant 0 : index
      %105 = vector.load %arg10[%c0_60, %c0_61] : memref<8x1xf32, #tpu.memory_space<vmem>>, vector<8x1xf32>
      %106 = vector.shape_cast %105 : vector<8x1xf32> to vector<1x8x1xf32>
      %cst_62 = arith.constant dense<0.000000e+00> : vector<1xf32>
      %107 = vector.multi_reduction <add>, %106, %cst_62 [1, 2] : vector<1x8x1xf32> to vector<1xf32>
      %108 = vector.shape_cast %107 : vector<1xf32> to vector<1x1x1xf32>
      %109 = vector.extract %108[0, 0, 0] : f32 from vector<1x1x1xf32>
      %c0_63 = arith.constant 0 : index
      %c2 = arith.constant 2 : index
      %110 = memref.load %arg7[%c0_63, %c2] : memref<8x8xf32, #tpu.memory_space<smem>>
      memref.store %109, %arg7[%c0_63, %c2] : memref<8x8xf32, #tpu.memory_space<smem>>
      %c0_64 = arith.constant 0 : index
      %c0_65 = arith.constant 0 : index
      %111 = vector.load %arg11[%c0_64, %c0_65] : memref<8x1xf32, #tpu.memory_space<vmem>>, vector<8x1xf32>
      %112 = vector.shape_cast %111 : vector<8x1xf32> to vector<1x8x1xf32>
      %cst_66 = arith.constant dense<0.000000e+00> : vector<1xf32>
      %113 = vector.multi_reduction <add>, %112, %cst_66 [1, 2] : vector<1x8x1xf32> to vector<1xf32>
      %114 = vector.shape_cast %113 : vector<1xf32> to vector<1x1x1xf32>
      %115 = vector.extract %114[0, 0, 0] : f32 from vector<1x1x1xf32>
      %c0_67 = arith.constant 0 : index
      %c3 = arith.constant 3 : index
      %116 = memref.load %arg7[%c0_67, %c3] : memref<8x8xf32, #tpu.memory_space<smem>>
      memref.store %115, %arg7[%c0_67, %c3] : memref<8x8xf32, #tpu.memory_space<smem>>
      %c0_68 = arith.constant 0 : index
      %c0_69 = arith.constant 0 : index
      %117 = vector.load %arg12[%c0_68, %c0_69] : memref<8x1xf32, #tpu.memory_space<vmem>>, vector<8x1xf32>
      %118 = vector.shape_cast %117 : vector<8x1xf32> to vector<1x8x1xf32>
      %cst_70 = arith.constant dense<0.000000e+00> : vector<1xf32>
      %119 = vector.multi_reduction <add>, %118, %cst_70 [1, 2] : vector<1x8x1xf32> to vector<1xf32>
      %120 = vector.shape_cast %119 : vector<1xf32> to vector<1x1x1xf32>
      %121 = vector.extract %120[0, 0, 0] : f32 from vector<1x1x1xf32>
      %c0_71 = arith.constant 0 : index
      %c4 = arith.constant 4 : index
      %122 = memref.load %arg7[%c0_71, %c4] : memref<8x8xf32, #tpu.memory_space<smem>>
      memref.store %121, %arg7[%c0_71, %c4] : memref<8x8xf32, #tpu.memory_space<smem>>
      %c0_72 = arith.constant 0 : index
      %c0_73 = arith.constant 0 : index
      %123 = vector.load %arg13[%c0_72, %c0_73] : memref<8x1xf32, #tpu.memory_space<vmem>>, vector<8x1xf32>
      %124 = vector.shape_cast %123 : vector<8x1xf32> to vector<1x8x1xf32>
      %cst_74 = arith.constant dense<0.000000e+00> : vector<1xf32>
      %125 = vector.multi_reduction <add>, %124, %cst_74 [1, 2] : vector<1x8x1xf32> to vector<1xf32>
      %126 = vector.shape_cast %125 : vector<1xf32> to vector<1x1x1xf32>
      %127 = vector.extract %126[0, 0, 0] : f32 from vector<1x1x1xf32>
      %c0_75 = arith.constant 0 : index
      %c5 = arith.constant 5 : index
      %128 = memref.load %arg7[%c0_75, %c5] : memref<8x8xf32, #tpu.memory_space<smem>>
      memref.store %127, %arg7[%c0_75, %c5] : memref<8x8xf32, #tpu.memory_space<smem>>
      %cst_76 = arith.constant 0.000000e+00 : f32
      %c0_77 = arith.constant 0 : index
      %c6 = arith.constant 6 : index
      %129 = memref.load %arg7[%c0_77, %c6] : memref<8x8xf32, #tpu.memory_space<smem>>
      memref.store %cst_76, %arg7[%c0_77, %c6] : memref<8x8xf32, #tpu.memory_space<smem>>
      %cst_78 = arith.constant 0.000000e+00 : f32
      %c0_79 = arith.constant 0 : index
      %c7 = arith.constant 7 : index
      %130 = memref.load %arg7[%c0_79, %c7] : memref<8x8xf32, #tpu.memory_space<smem>>
      memref.store %cst_78, %arg7[%c0_79, %c7] : memref<8x8xf32, #tpu.memory_space<smem>>
    } else {
    }
    return
  }
  func.func @transform_0(%arg0: i32, %arg1: i32) -> (i32, i32) {
    %c1_i32 = arith.constant 1 : i32
    %0 = arith.muli %arg0, %c1_i32 : i32
    %1 = arith.addi %0, %arg1 : i32
    %c0_i32 = arith.constant 0 : i32
    %2 = arith.minsi %1, %c0_i32 : i32
    %c0_i32_0 = arith.constant 0 : i32
    %c0_i32_1 = arith.constant 0 : i32
    return %2, %c0_i32_0 : i32, i32
  }
  func.func @transform_1(%arg0: i32, %arg1: i32) -> (i32, i32) {
    %c1_i32 = arith.constant 1 : i32
    %0 = arith.muli %arg0, %c1_i32 : i32
    %1 = arith.addi %0, %arg1 : i32
    %c0_i32 = arith.constant 0 : i32
    %2 = arith.minsi %1, %c0_i32 : i32
    %c0_i32_0 = arith.constant 0 : i32
    %c0_i32_1 = arith.constant 0 : i32
    return %2, %c0_i32_0 : i32, i32
  }
  func.func @transform_2(%arg0: i32, %arg1: i32) -> (i32, i32) {
    %c1_i32 = arith.constant 1 : i32
    %0 = arith.muli %arg0, %c1_i32 : i32
    %1 = arith.addi %0, %arg1 : i32
    %c0_i32 = arith.constant 0 : i32
    %2 = arith.minsi %1, %c0_i32 : i32
    %c0_i32_0 = arith.constant 0 : i32
    %c0_i32_1 = arith.constant 0 : i32
    return %2, %c0_i32_0 : i32, i32
  }
  func.func @transform_3(%arg0: i32, %arg1: i32) -> (i32, i32) {
    %c1_i32 = arith.constant 1 : i32
    %0 = arith.muli %arg0, %c1_i32 : i32
    %1 = arith.addi %0, %arg1 : i32
    %c0_i32 = arith.constant 0 : i32
    %2 = arith.minsi %1, %c0_i32 : i32
    %c0_i32_0 = arith.constant 0 : i32
    %c0_i32_1 = arith.constant 0 : i32
    return %2, %c0_i32_0 : i32, i32
  }
  func.func @transform_4(%arg0: i32, %arg1: i32) -> (i32, i32) {
    %c1_i32 = arith.constant 1 : i32
    %0 = arith.muli %arg0, %c1_i32 : i32
    %1 = arith.addi %0, %arg1 : i32
    %c0_i32 = arith.constant 0 : i32
    %2 = arith.minsi %1, %c0_i32 : i32
    %c0_i32_0 = arith.constant 0 : i32
    %c0_i32_1 = arith.constant 0 : i32
    return %2, %c0_i32_0 : i32, i32
  }
  func.func @transform_5(%arg0: i32, %arg1: i32) -> (i32, i32) {
    %c0_i32 = arith.constant 0 : i32
    %c0_i32_0 = arith.constant 0 : i32
    return %arg0, %c0_i32 : i32, i32
  }
}

</mosaic_0001>

<bundles_post_ra>
// kernel: tpu_custom_call.1
= control target key start
LH: loop header
LB: loop body
LE: loop exit
PB: predicated region body
PF: predicated region fallthrough
CT: control target
= control target key end

     0   :  { %10 = vsyncpa [#allocation9], 0  ;;  %s612_s0 = inlined_call_operand.vmem [shape: f32[8,32], index: 0, kind: input, shape index: {}]   ;;  %s613_s1 = inlined_call_operand.vmem [shape: f32[8,32], index: 1, kind: input, shape index: {}]   ;;  %s614_s2 = inlined_call_operand.hbm [shape: f32[8,32], index: 2, kind: input, shape index: {}]   ;;  %s615_s3 = inlined_call_operand.vmem [shape: s32[8,1], index: 3, kind: input, shape index: {}]   ;;  %s616_s4 = inlined_call_operand.vmem [shape: f32[8,1], index: 4, kind: input, shape index: {}]   ;;  %s617_s5 = inlined_call_operand.hbm [shape: f32[8,8], index: 5, kind: output, shape index: {}]  }
   0x1   :  { %11 = vsyncpa [#allocation10], 0  ;;  %s46_s20 = sshll.u32 %s614_s2, 4  ;;  %s488_s21 = smov [#allocation8]   ;;  %s47_s20 = int_to_ptr.hbm [resolvable:$true] %s46_s20 }
   0x2   :  { %s48_s22 = sshll.u32 %s488_s21, 4  ;;  %s49_s22 = int_to_ptr.vmem [resolvable:$true] %s48_s22 }
   0x3   :  { %51 = dma.hbm_to_vmem [thread:$0]  %s47_s20, 128, %s49_s22, [#allocation9]  }
   0x4   :  { %484 = dma.done.wait [#allocation9], 128  }
   0x5   :  { %485 = vsyncadd [#allocation9], 4294967168  ;;  %vm171_vm0 = vcmask 261120   ;;  %v529_v0 = vld [vmem:[%s612_s0] sm:$0xff]  ;;  %v247_v1 = vld [vmem:[#allocation8] sm:$0xff]  ;;  %v489_v6 = vmov 0   ;;  %v164_v8 = vlaneseq }
   0x6   :  { %v172_v2 = vsel %vm171_vm0, %v529_v0, -inf  ;;  %v248_v3 = vsel %vm171_vm0, %v247_v1, -inf  ;;  %v537_v4 = vld [vmem:[%s613_s1] sm:$0xff]  ;;  %439 = vset.pattern.permute.xlu0 %v489_v6  ;;  %vm155_vm4 = vcmask 7168   ;;  %v490_v36 = vmov 0.0   ;;  %s382_s30 = sshll.u32 %s617_s5, 4  ;;  %s383_s30 = int_to_ptr.hbm [resolvable:$true] %s382_s30 }
   0x7   :  { %173 = vmax.xlane.f32.xlu0 %v172_v2  ;;  %249 = vmax.xlane.f32.xlu1 %v248_v3  ;;  %v210_v5 = vsel %vm171_vm0, %v537_v4, -inf  ;;  %v544_v7 = vld [vmem:[%s615_s3] sm:$0xff]  ;;  %v547_v9 = vand.u32 127, %v164_v8  ;;  %159 = vst.msk [vmem:[#allocation5] sm:$0xff] %vm155_vm4, %v490_v36  ;;  %s492_s11 = smov [#allocation11]  }
   0x8   :  { %156 = vst.msk [vmem:[#allocation2] sm:$0xff] %vm155_vm4, %v490_v36  ;;  %v163_v51 = vld [vmem:[%s616_s4] sm:$0xff]  ;;  %s491_s4 = smov 0.0  }
   0x9   :  { %157 = vst.msk [vmem:[#allocation3] sm:$0xff] %vm155_vm4, %v490_v36  ;;  %vm276_vm11 = vcmp.gt.f32.partialorder %v163_v51, 0.0  ;;  %374 = sst [smem:[#allocation11 + $0x6]] %s491_s4 }
   0xa   :  { %158 = vst.msk [vmem:[#allocation4] sm:$0xff] %vm155_vm4, %v490_v36  ;;  %376 = sst [smem:[#allocation11 + $0x7]] %s491_s4 }
   0xb   :  { %160 = vst.msk [vmem:[#allocation6] sm:$0xff] %vm155_vm4, %v490_v36 }
   0xc   :  { %161 = vst.msk [vmem:[#allocation7] sm:$0xff] %vm155_vm4, %v490_v36 }
   0xe   :  { %v283_v63 = vld [vmem:[#allocation5] sm:$0xff] }
   0xf   :  { %211 = vmax.xlane.f32.xlu0 %v210_v5 }
  0x11   :  { %v280_v52 = vld [vmem:[#allocation4] sm:$0xff] }
  0x12   :  { %v281_v53 = vadd.f32 %v280_v52, %v163_v51 }
  0x14   :  { %282 = vst.msk [vmem:[#allocation4] sm:$0xff] %vm155_vm4, %v281_v53 }
  0x1b   :  { %v321_v54 = vld [vmem:[#allocation4] sm:$0xff] }
  0x1c   :  { %v322_v55 = vsel %vm155_vm4, %v321_v54, 0.0 }
  0x23   :  { %167 = vperm.xlu0 %439, %v544_v7  }
  0x7a   :  { %v549_v10 = vpop.xlane.xlu0 %173  ;;  %v250_v14 = vpop.xlane.xlu1 %249 }
  0x7b   :  { %vm189_vm1 = vcmp.eq.f32.partialorder %v529_v0, %v549_v10  ;;  %vm251_vm2 = vcmp.eq.f32.partialorder %v247_v1, %v250_v14  ;;  %v175_v24 = vsub.f32 %v529_v0, %v549_v10 }
  0x7c   :  { %v190_v11 = vsel %vm189_vm1, %v547_v9, 32  ;;  %v252_v18 = vsel %vm251_vm2, %v547_v9, 32 }
  0x7d   :  { %v191_v12 = vsel %vm171_vm0, %v190_v11, 2147483647  ;;  %v253_v23 = vsel %vm171_vm0, %v252_v18, 2147483647  ;;  %v176_v27 = vmul.f32 1.442695, %v175_v24 }
  0x7e   :  { %v193_v13 = vshra.s32 %v191_v12, 16  ;;  %v255_v26 = vshra.s32 %v253_v23, 16  ;;  %v192_v33 = vand.u32 65535, %v191_v12  ;;  %v254_v43 = vand.u32 65535, %v253_v23  ;;  %v286_v11 = vld [vmem:[#allocation6] sm:$0xff]  ;;  %v275_v24 = vld [vmem:[#allocation3] sm:$0xff] }
  0x80   :  { %v195_v15 = vcvt.s32.f32 %v193_v13  ;;  %v257_v30 = vcvt.s32.f32 %v255_v26  ;;  %v194_v35 = vcvt.s32.f32 %v192_v33  ;;  %v256_v46 = vcvt.s32.f32 %v254_v43 }
  0x82   :  { %196 = vmin.xlane.f32.xlu1 %v195_v15  ;;  %v555_v16 = vpop.xlane.xlu0 %211 }
  0x83   :  { %v213_v17 = vsub.f32 %v537_v4, %v555_v16  ;;  %vm227_vm3 = vcmp.eq.f32.partialorder %v537_v4, %v555_v16 }
  0x84   :  { %v228_v19 = vsel %vm227_vm3, %v547_v9, 32 }
  0x85   :  { %v214_v20 = vmul.f32 1.442695, %v213_v17  ;;  %v229_v21 = vsel %vm171_vm0, %v228_v19, 2147483647 }
  0x86   :  { %v231_v22 = vshra.s32 %v229_v21, 16  ;;  %v230_v38 = vand.u32 65535, %v229_v21 }
  0x87   :  { %440 = vpow2.f32 %v214_v20 }
  0x88   :  { %v233_v25 = vcvt.s32.f32 %v231_v22  ;;  %442 = vpow2.f32 %v176_v27  ;;  %v232_v41 = vcvt.s32.f32 %v230_v38 }
  0x8a   :  { %234 = vmin.xlane.f32.xlu2 %v233_v25 }
  0x8d   :  { %v441_v28 = vpop.eup %440 }
  0x8e   :  { %v216_v29 = vsel %vm171_vm0, %v441_v28, 0.0  ;;  %v443_v31 = vpop.eup %442 }
  0x8f   :  { %217 = vadd.xlane.f32.xlu1 %v216_v29  ;;  %v178_v32 = vsel %vm171_vm0, %v443_v31, 0.0  ;;  %v289_v29 = vld [vmem:[#allocation7] sm:$0xff] }
  0x92   :  { %258 = vmin.xlane.f32.xlu2 %v257_v30 }
  0x95   :  { %v168_v39 = vpop.permute.xlu0 %167 }
  0x96   :  { %vm169_vm7 = vcmp.eq.s32.totalorder %v547_v9, %v168_v39 }
  0x97   :  { %v222_v44 = vsel %vm169_vm7, %v537_v4, 0.0  ;;  %v184_v49 = vsel %vm169_vm7, %v529_v0, 0.0 }
  0x98   :  { %v223_v47 = vsel %vm171_vm0, %v222_v44, 0.0  ;;  %v185_v50 = vsel %vm171_vm0, %v184_v49, 0.0 }
  0x9a   :  { %179 = vadd.xlane.f32.xlu2 %v178_v32 }
  0xf5   :  { %v197_v34 = vpop.xlane.xlu1 %196 }
  0xf6   :  { %vm198_vm5 = vcmp.eq.f32.partialorder %v195_v15, %v197_v34  ;;  %v203_v57 = vcvt.f32.s32 %v197_v34  ;;  %v271_v34 = vld [vmem:[#allocation2] sm:$0xff] }
  0xf7   :  { %v199_v37 = vsel %vm198_vm5, %v194_v35, inf }
  0xf8   :  { %200 = vmin.xlane.f32.xlu1 %v199_v37  ;;  %v204_v60 = vshll.u32 %v203_v57, 16 }
  0xfd   :  { %v235_v40 = vpop.xlane.xlu2 %234 }
  0xfe   :  { %vm236_vm6 = vcmp.eq.f32.partialorder %v233_v25, %v235_v40  ;;  %v241_v0 = vcvt.f32.s32 %v235_v40 }
  0xff   :  { %v237_v42 = vsel %vm236_vm6, %v232_v41, inf }
 0x100   :  { %238 = vmin.xlane.f32.xlu2 %v237_v42  ;;  %v242_v5 = vshll.u32 %v241_v0, 16 }
 0x102   :  { %v218_v56 = vpop.xlane.xlu1 %217 }
 0x103   :  { %444 = vlog2.f32 %v218_v56 }
 0x105   :  { %v259_v45 = vpop.xlane.xlu2 %258 }
 0x106   :  { %vm260_vm8 = vcmp.eq.f32.partialorder %v257_v30, %v259_v45  ;;  %v265_v12 = vcvt.f32.s32 %v259_v45 }
 0x107   :  { %v261_v48 = vsel %vm260_vm8, %v256_v46, inf }
 0x108   :  { %262 = vmin.xlane.f32.xlu1 %v261_v48  ;;  %224 = vadd.xlane.f32.xlu2 %v223_v47  ;;  %v266_v21 = vshll.u32 %v265_v12, 16 }
 0x109   :  { %v445_v3 = vpop.eup %444 }
 0x10a   :  { %v220_v8 = vmul.f32 0.6931472, %v445_v3 }
 0x10c   :  { %v221_v15 = vadd.f32 %v220_v8, %v555_v16 }
 0x10d   :  { %v180_v58 = vpop.xlane.xlu2 %179 }
 0x10e   :  { %446 = vlog2.f32 %v180_v58 }
 0x110   :  { %186 = vadd.xlane.f32.xlu1 %v185_v50  ;;  %323 = vadd.xlane.f32.xlu2 %v322_v55 }
 0x114   :  { %v447_v17 = vpop.eup %446 }
 0x115   :  { %v182_v26 = vmul.f32 0.6931472, %v447_v17 }
 0x117   :  { %v183_v32 = vadd.f32 %v182_v26, %v549_v10 }
 0x16b   :  { %v201_v59 = vpop.xlane.xlu1 %200 }
 0x16c   :  { %v202_v61 = vcvt.f32.s32 %v201_v59 }
 0x16e   :  { %v205_v62 = vadd.s32 %v204_v60, %v202_v61 }
 0x170   :  { %vm206_vm9 = vcmp.eq.s32.totalorder %v205_v62, %v544_v7 }
 0x171   :  { %v419_v1 = vsel %vm206_vm9, 1.0, %v490_v36 }
 0x172   :  { %v284_v2 = vadd.f32 %v419_v1, %v283_v63 }
 0x173   :  { %v239_v4 = vpop.xlane.xlu2 %238 }
 0x174   :  { %285 = vst.msk [vmem:[#allocation5] sm:$0xff] %vm155_vm4, %v284_v2  ;;  %v240_v6 = vcvt.f32.s32 %v239_v4 }
 0x176   :  { %v243_v9 = vadd.s32 %v242_v5, %v240_v6 }
 0x178   :  { %vm244_vm10 = vcmp.eq.s32.totalorder %v243_v9, %v544_v7 }
 0x179   :  { %v420_v13 = vsel %vm244_vm10, 1.0, %v490_v36 }
 0x17a   :  { %v287_v14 = vadd.f32 %v420_v13, %v286_v11 }
 0x17b   :  { %v263_v18 = vpop.xlane.xlu1 %262  ;;  %v225_v19 = vpop.xlane.xlu2 %224  ;;  %v334_v20 = vld [vmem:[#allocation5] sm:$0xff] }
 0x17c   :  { %288 = vst.msk [vmem:[#allocation6] sm:$0xff] %vm155_vm4, %v287_v14  ;;  %v264_v22 = vcvt.f32.s32 %v263_v18  ;;  %v226_v23 = vsub.f32 %v221_v15, %v225_v19  ;;  %v335_v25 = vsel %vm155_vm4, %v334_v20, 0.0 }
 0x17d   :  { %336 = vadd.xlane.f32.xlu0 %v335_v25 }
 0x17e   :  { %v267_v27 = vadd.s32 %v266_v21, %v264_v22  ;;  %v277_v28 = vsel %vm276_vm11, %v226_v23, 0.0 }
 0x17f   :  { %v278_v30 = vadd.f32 %v277_v28, %v275_v24 }
 0x180   :  { %vm268_vm12 = vcmp.eq.s32.totalorder %v267_v27, %v544_v7 }
 0x181   :  { %v421_v16 = vsel %vm268_vm12, 1.0, %v490_v36  ;;  %279 = vst.msk [vmem:[#allocation3] sm:$0xff] %vm155_vm4, %v278_v30 }
 0x182   :  { %v290_v31 = vadd.f32 %v421_v16, %v289_v29 }
 0x183   :  { %v187_v33 = vpop.xlane.xlu1 %186  ;;  %v347_v7 = vld [vmem:[#allocation6] sm:$0xff]  ;;  %v324_v43 = vpop.xlane.xlu2 %323 }
 0x184   :  { %291 = vst.msk [vmem:[#allocation7] sm:$0xff] %vm155_vm4, %v290_v31  ;;  %v188_v35 = vsub.f32 %v183_v32, %v187_v33  ;;  %v348_v41 = vsel %vm155_vm4, %v347_v7, 0.0  ;;  %v325_v45 = vrot.slane %v324_v43, 4 }
 0x186   :  { %v272_v37 = vadd.f32 %v271_v34, %v188_v35  ;;  %v326_v50 = vadd.f32 %v325_v45, %v324_v43 }
 0x188   :  { %274 = vst.msk [vmem:[#allocation2] sm:$0xff] %vm155_vm4, %v272_v37  ;;  %v308_v38 = vld [vmem:[#allocation3] sm:$0xff]  ;;  %v327_v54 = vrot.slane %v326_v50, 2 }
 0x189   :  { %v309_v39 = vsel %vm155_vm4, %v308_v38, 0.0 }
 0x18a   :  { %310 = vadd.xlane.f32.xlu1 %v309_v39  ;;  %v328_v63 = vadd.f32 %v327_v54, %v326_v50 }
 0x18b   :  { %v360_v10 = vld [vmem:[#allocation7] sm:$0xff] }
 0x18c   :  { %v361_v42 = vsel %vm155_vm4, %v360_v10, 0.0  ;;  %v329_v9 = vrot.slane %v328_v63, 1 }
 0x18e   :  { %v330_v18 = vadd.f32 %v329_v9, %v328_v63 }
 0x18f   :  { %v295_v40 = vld [vmem:[#allocation2] sm:$0xff] }
 0x190   :  { %v296_v36 = vsel %vm155_vm4, %v295_v40, 0.0 }
 0x191   :  { %297 = vadd.xlane.f32.xlu2 %v296_v36 }
 0x192   :  { %349 = vadd.xlane.f32.xlu1 %v348_v41 }
 0x199   :  { %362 = vadd.xlane.f32.xlu2 %v361_v42 }
 0x1f0   :  { %v337_v44 = vpop.xlane.xlu0 %336 }
 0x1f1   :  { %v338_v47 = vrot.slane %v337_v44, 4 }
 0x1f3   :  { %v339_v51 = vadd.f32 %v338_v47, %v337_v44 }
 0x1f5   :  { %v340_v57 = vrot.slane %v339_v51, 2 }
 0x1f7   :  { %v341_v0 = vadd.f32 %v340_v57, %v339_v51 }
 0x1f9   :  { %v342_v11 = vrot.slane %v341_v0, 1 }
 0x1fb   :  { %v343_v20 = vadd.f32 %v342_v11, %v341_v0 }
 0x1fd   :  { %v311_v46 = vpop.xlane.xlu1 %310 }
 0x1fe   :  { %v312_v48 = vrot.slane %v311_v46, 4 }
 0x200   :  { %v313_v49 = vadd.f32 %v312_v48, %v311_v46 }
 0x202   :  { %v314_v52 = vrot.slane %v313_v49, 2 }
 0x204   :  { %v298_v53 = vpop.xlane.xlu2 %297  ;;  %v315_v61 = vadd.f32 %v314_v52, %v313_v49 }
 0x205   :  { %v299_v55 = vrot.slane %v298_v53, 4  ;;  %v350_v56 = vpop.xlane.xlu1 %349 }
 0x206   :  { %v351_v58 = vrot.slane %v350_v56, 4  ;;  %v316_v5 = vrot.slane %v315_v61, 1 }
 0x207   :  { %v300_v59 = vadd.f32 %v299_v55, %v298_v53 }
 0x208   :  { %v352_v60 = vadd.f32 %v351_v58, %v350_v56  ;;  %v317_v15 = vadd.f32 %v316_v5, %v315_v61 }
 0x209   :  { %v301_v62 = vrot.slane %v300_v59, 2 }
 0x20a   :  { %v353_v1 = vrot.slane %v352_v60, 2 }
 0x20b   :  { %v302_v2 = vadd.f32 %v301_v62, %v300_v59 }
 0x20c   :  { %v354_v3 = vadd.f32 %v353_v1, %v352_v60  ;;  %v363_v4 = vpop.xlane.xlu2 %362 }
 0x20d   :  { %v364_v6 = vrot.slane %v363_v4, 4  ;;  %v303_v8 = vrot.slane %v302_v2, 1 }
 0x20e   :  { %v355_v12 = vrot.slane %v354_v3, 1 }
 0x20f   :  { %v365_v13 = vadd.f32 %v364_v6, %v363_v4  ;;  %v304_v14 = vadd.f32 %v303_v8, %v302_v2 }
 0x210   :  { %v356_v19 = vadd.f32 %v355_v12, %v354_v3 }
 0x211   :  { %v366_v17 = vrot.slane %v365_v13, 2  ;;  %422 = vpush %v304_v14 }
 0x212   :  { %424 = vpush %v317_v15 }
 0x213   :  { %v367_v21 = vadd.f32 %v366_v17, %v365_v13  ;;  %426 = vpush %v330_v18 }
 0x214   :  { %428 = vpush %v343_v20 }
 0x215   :  { %430 = vpush %v356_v19  ;;  %v368_v22 = vrot.slane %v367_v21, 1 }
 0x217   :  { %v369_v23 = vadd.f32 %v368_v22, %v367_v21 }
 0x219   :  { %432 = vpush %v369_v23 }
 0x242   :  { %s423_s27 = spop %422 }
 0x243   :  { %307 = sst [smem:[#allocation11]] %s423_s27  ;;  %s425_s6 = spop %424 }
 0x244   :  { %320 = sst [smem:[#allocation11 + $0x1]] %s425_s6  ;;  %s427_s7 = spop %426 }
 0x245   :  { %333 = sst [smem:[#allocation11 + $0x2]] %s427_s7  ;;  %s429_s8 = spop %428 }
 0x246   :  { %346 = sst [smem:[#allocation11 + $0x3]] %s429_s8  ;;  %s431_s9 = spop %430 }
 0x247   :  { %359 = sst [smem:[#allocation11 + $0x4]] %s431_s9 }
 0x24a   :  { %s433_s10 = spop %432 }
 0x24b   :  { %372 = sst [smem:[#allocation11 + $0x5]] %s433_s10 }
 0x24c   :  { %385 = dma.smem_to_hbm %s492_s11, 128, %s383_s30, [#allocation10]  }
 0x24d   :  { %486 = dma.done.wait [#allocation10], 128  }
 0x24e   :  { %487 = vsyncadd [#allocation10], 4294967168 }
 0x24f   :  { %390 = sfence }
 0x250   :  { %391 = vsyncpa [#allocation9], 1 }
 0x251   :  { %392 = vsyncpa [#allocation10], 1 }

</bundles_post_ra>
